<compile_context>
chip_gen: v7x
topology: tpu7x:2x2x1
jax: 0.10.0
libtpu: 0.0.40
codegen_flags: <defaults>
</compile_context>

<pallas_src>
import jax
import jax.numpy as jnp
from jax.experimental import pallas as pl
from jax.experimental.pallas import tpu as pltpu


# Packed sublane multiple per element size (f32 -> 8, bf16 -> 16, int8/fp8 -> 32).
_SUBLANE_MULTIPLE = {1: 32, 2: 16, 4: 8, 8: 8}


def _silu_kernel(x_ref, o_ref):
    x = x_ref[...]
    # bf16 stays native (v6e/v7x EUP/VPU handle it); everything else in f32.
    cdt = jnp.bfloat16 if x.dtype == jnp.bfloat16 else jnp.float32
    xf = x.astype(cdt)
    # sigmoid(x) = 0.5 * (tanh(x/2) + 1): a single EUP transcendental per
    # element (no exp + divide), so the kernel stays HBM-DMA-bound on v7x.
    sig = (jnp.tanh(xf * 0.5) + 1.0) * 0.5
    o_ref[...] = (xf * sig).astype(o_ref.dtype)


def _silu_jnp(x):
    """Plain-XLA fallback (tiny / ragged / non-float tensors)."""
    if not jnp.issubdtype(x.dtype, jnp.floating):
        xf = x.astype(jnp.float32)
        return (xf * jax.nn.sigmoid(xf)).astype(x.dtype)
    return x * jax.nn.sigmoid(x)


def silu_pallas(x: jax.Array,
                *,
                target_block_bytes: int = 4 * 1024 * 1024,
                min_pallas_bytes: int = 128 * 1024) -> jax.Array:
    """Elementwise SiLU (x * sigmoid(x)); semantics of the PyTorch SiLU module."""
    orig_shape = x.shape
    n = x.size
    if n == 0:
        return x

    elem_bytes = jnp.dtype(x.dtype).itemsize
    total_bytes = n * elem_bytes

    # Fast path: tiny tensors (launch overhead dominates), non-float dtypes,
    # and ragged element counts (n % 128 != 0).  For ragged shapes the fused
    # XLA elementwise is already at read-N + write-N memory traffic, whereas
    # padding / prefix-slicing / concatenating around a custom call would each
    # materialize an extra full HBM copy.
    if (total_bytes < min_pallas_bytes
            or not jnp.issubdtype(x.dtype, jnp.floating)
            or n % 128 != 0):
        return _silu_jnp(x)

    # --- lane-dense 2-D slab layout (rows, lanes) ----------------------------
    lanes = 128
    for cand in (8192, 4096, 2048, 1024, 512, 256, 128):
        if n % cand == 0:
            lanes = cand
            break
    rows = n // lanes
    bytes_per_row = lanes * elem_bytes

    # --- block_rows: ~target_block_bytes, aligned to the packed sublane tile -
    sub = _SUBLANE_MULTIPLE.get(elem_bytes, 8)
    block_rows = max(sub, (target_block_bytes // bytes_per_row) // sub * sub)

    if total_bytes > (1 << 20):
        # Guarantee >= ~4 grid steps so both TensorCores on v7x get several
        # blocks (grid steps are sharded across TCs via "parallel" semantics).
        cap = max(sub, (rows // 4) // sub * sub)
        block_rows = min(block_rows, cap)

    if block_rows > rows:
        block_rows = rows  # single full-extent block (legal block shape)

    grid = (pl.cdiv(rows, block_rows),)

    x2d = x.reshape(rows, lanes)  # contiguous reshape: no copy

    out2d = pl.pallas_call(
        _silu_kernel,
        out_shape=jax.ShapeDtypeStruct((rows, lanes), x.dtype),
        grid_spec=pltpu.PrefetchScalarGridSpec(
            num_scalar_prefetch=0,
            grid=grid,
            # Default double-buffering; add pipeline_mode=pl.Buffered(3) only
            # if xprof shows exposed DMA gaps at block boundaries on v7x.
            in_specs=[pl.BlockSpec((block_rows, lanes), lambda i: (i, 0))],
            out_specs=pl.BlockSpec((block_rows, lanes), lambda i: (i, 0)),
        ),
        compiler_params=pltpu.CompilerParams(
            dimension_semantics=("parallel",),
            vmem_limit_bytes=32 * 1024 * 1024,
        ),
    )(x2d)

    return out2d.reshape(orig_shape)


def _silu_ref(x):
    xf = x.astype(jnp.float32)
    return (xf * jax.nn.sigmoid(xf)).astype(jnp.float32)


if __name__ == "__main__":
    key = jax.random.PRNGKey(0)
    k1, k2, k3, k4, k5 = jax.random.split(key, 5)

    # 1) Small NCHW activation matching the module's typical use.
    #    Takes the jnp fast path by default (launch overhead would dominate).
    x1 = jax.random.normal(k1, (2, 4, 16, 16), dtype=jnp.float32)
    y1 = silu_pallas(x1)
    jax.block_until_ready(y1)
    assert y1.shape == x1.shape and y1.dtype == x1.dtype
    assert jnp.allclose(y1.astype(jnp.float32), _silu_ref(x1), atol=1e-6, rtol=1e-6)

    # 2) Same tensor, Pallas path forced (validates the kernel at small size).
    y1p = silu_pallas(x1, min_pallas_bytes=0)
    jax.block_until_ready(y1p)
    assert jnp.allclose(y1p.astype(jnp.float32), _silu_ref(x1), atol=2e-3, rtol=2e-3)

    # 3) Larger f32 activation (2 MiB): multi-step grid (>=4 blocks, megacore).
    x2 = jax.random.normal(k2, (2, 64, 64, 64), dtype=jnp.float32)
    y2 = silu_pallas(x2)
    jax.block_until_ready(y2)
    assert jnp.allclose(y2.astype(jnp.float32), _silu_ref(x2), atol=2e-3, rtol=2e-3)

    # 4) Ragged edge blocks in the grid (forced small block size).
    x3 = jax.random.normal(k3, (1, 8, 72, 100), dtype=jnp.float32)  # rows=225, lanes=256
    y3 = silu_pallas(x3, target_block_bytes=8 * 256 * 4, min_pallas_bytes=0)
    jax.block_until_ready(y3)
    assert jnp.allclose(y3.astype(jnp.float32), _silu_ref(x3), atol=2e-3, rtol=2e-3)

    # 5) Ragged element count (not a multiple of 128) -> jnp fallback path.
    x4 = jax.random.normal(k4, (3, 5, 7), dtype=jnp.float32)
    y4 = silu_pallas(x4)
    jax.block_until_ready(y4)
    assert y4.shape == x4.shape
    assert jnp.allclose(y4.astype(jnp.float32), _silu_ref(x4), atol=1e-6, rtol=1e-6)

    # 6) bf16 input: native bf16 compute in the kernel (16-row sublane tile).
    x5 = jax.random.normal(k5, (2, 4, 64, 64), dtype=jnp.bfloat16)
    y5 = silu_pallas(x5, min_pallas_bytes=0)
    jax.block_until_ready(y5)
    assert y5.dtype == jnp.bfloat16 and y5.shape == x5.shape
    assert jnp.allclose(y5.astype(jnp.float32), _silu_ref(x5), atol=3e-2, rtol=3e-2)

    print("KERNEL_OK")
</pallas_src>

<mosaic_0001>
module attributes {stable_mosaic.version = 11 : i64} {
  func.func @_silu_kernel(%arg0: i32, %arg1: memref<1x2048xf32, #tpu.memory_space<vmem>>, %arg2: memref<1x2048xf32, #tpu.memory_space<vmem>>) attributes {dimension_semantics = [#tpu.dimension_semantics<parallel>], iteration_bounds = array<i64: 1>, scalar_prefetch = 0 : i64, scratch_operands = 0 : i64, tpu.core_type = #tpu.core_type<tc>, window_params = [{transform_indices = @transform_0, window_bounds = array<i64: 1, 2048>}, {transform_indices = @transform_1, window_bounds = array<i64: 1, 2048>}]} {
    %c0 = arith.constant 0 : index
    %c0_0 = arith.constant 0 : index
    %0 = vector.load %arg1[%c0, %c0_0] : memref<1x2048xf32, #tpu.memory_space<vmem>>, vector<1x2048xf32>
    %cst = arith.constant 5.000000e-01 : f32
    %1 = vector.broadcast %cst : f32 to vector<1x2048xf32>
    %2 = arith.mulf %0, %1 : vector<1x2048xf32>
    %3 = math.tanh %2 : vector<1x2048xf32>
    %cst_1 = arith.constant 1.000000e+00 : f32
    %4 = vector.broadcast %cst_1 : f32 to vector<1x2048xf32>
    %5 = arith.addf %3, %4 : vector<1x2048xf32>
    %cst_2 = arith.constant 5.000000e-01 : f32
    %6 = vector.broadcast %cst_2 : f32 to vector<1x2048xf32>
    %7 = arith.mulf %5, %6 : vector<1x2048xf32>
    %8 = arith.mulf %0, %7 : vector<1x2048xf32>
    %c0_3 = arith.constant 0 : index
    %c0_4 = arith.constant 0 : index
    %9 = vector.load %arg2[%c0_3, %c0_4] : memref<1x2048xf32, #tpu.memory_space<vmem>>, vector<1x2048xf32>
    tpu.vector_store %arg2[%c0_3, %c0_4], %8 {strides = array<i32>} : memref<1x2048xf32, #tpu.memory_space<vmem>>, vector<1x2048xf32>,
    return
  }
  func.func @transform_0(%arg0: i32) -> (i32, i32) {
    %c0_i32 = arith.constant 0 : i32
    %c0_i32_0 = arith.constant 0 : i32
    return %arg0, %c0_i32 : i32, i32
  }
  func.func @transform_1(%arg0: i32) -> (i32, i32) {
    %c0_i32 = arith.constant 0 : i32
    %c0_i32_0 = arith.constant 0 : i32
    return %arg0, %c0_i32 : i32, i32
  }
}

</mosaic_0001>

<bundles_post_ra>
// kernel: tpu_custom_call.1
= control target key start
LH: loop header
LB: loop body
LE: loop exit
PB: predicated region body
PF: predicated region fallthrough
CT: control target
= control target key end

     0   :  { %6 = vsyncpa [#allocation3], 0  ;;  %s140_s0 = inlined_call_operand.hbm [shape: f32[1,2048], index: 0, kind: input, shape index: {}]   ;;  %s141_s1 = inlined_call_operand.hbm [shape: f32[1,2048], index: 1, kind: output, shape index: {}]  }
   0x1   :  { %7 = vsyncpa [#allocation4], 0  ;;  %s104_s6 = smov [#allocation2]   ;;  %s56_s10 = scalar_lea.hbm %s140_s0, 256 }
   0x2   :  { %s14_s7 = sshll.u32 %s104_s6, 4  ;;  %p57_p0 = scmp.ne.s32.totalorder %s140_s0, %s56_s10  ;;  %s15_s7 = int_to_ptr.vmem [resolvable:$true] %s14_s7 }
   0x3   :  { %p60_p1 = scmp.lt.u32.totalorder %s56_s10, %s140_s0 }
   0x5   :  { %p62_p2 = pnand %p60_p1, %p57_p0 }
   0x7   :  { %65 = shalt.err (!%p62_p2)
}
   0x8   :  { %s66_s15 = scalar_lea.vmem %s15_s7, 256  ;;  %p71_p4 = scmp.lt.s32.totalorder %s15_s7, %s15_s7 }
   0x9   :  { %p67_p3 = scmp.ne.s32.totalorder %s15_s7, %s66_s15  ;;  %p72_p5 = scmp.lt.s32.totalorder %s66_s15, %s66_s15 }
   0xb   :  { %p73_p6 = por %p72_p5, %p71_p4 }
   0xd   :  { %p74_p7 = pnand %p73_p6, %p67_p3 }
   0xf   :  { %77 = shalt.err (!%p74_p7)
}
  0x10   :  { %17 = dma.hbm_to_vmem [thread:$0]  %s140_s0, 256, %s15_s7, [#allocation3]  }
  0x11   :  { %100 = dma.done.wait [#allocation3], 256  }
  0x12   :  { %101 = vsyncadd [#allocation3], 4294967040  ;;  %v21_v0 = vld [vmem:[#allocation2] sm:$0xff]  ;;  %v22_v1 = vld [vmem:[#allocation2 + $0x8] sm:$0xff]  ;;  %s105_s18 = smov [#allocation5]  }
  0x13   :  { %v23_v2 = vmul.f32 0.5, %v21_v0  ;;  %v24_v3 = vmul.f32 0.5, %v22_v1  ;;  %s41_s19 = sshll.u32 %s105_s18, 4  ;;  %s42_s19 = int_to_ptr.vmem [resolvable:$true] %s41_s19 }
  0x14   :  { %s78_s0 = scalar_lea.vmem %s42_s19, 256  ;;  %p83_p9 = scmp.lt.s32.totalorder %s42_s19, %s42_s19 }
  0x15   :  { %52 = vtanh.f32 %v23_v2  ;;  %p79_p8 = scmp.ne.s32.totalorder %s42_s19, %s78_s0  ;;  %p84_p10 = scmp.lt.s32.totalorder %s78_s0, %s78_s0 }
  0x16   :  { %54 = vtanh.f32 %v24_v3 }
  0x17   :  { %p85_p11 = por %p84_p10, %p83_p9 }
  0x19   :  { %p86_p12 = pnand %p85_p11, %p79_p8 }
  0x1f   :  { %v53_v4 = vpop.eup %52 }
  0x20   :  { %v55_v5 = vpop.eup %54  ;;  %v27_v6 = vadd.f32 1.0, %v53_v4 }
  0x21   :  { %v28_v7 = vadd.f32 1.0, %v55_v5 }
  0x22   :  { %v29_v8 = vmul.f32 0.5, %v27_v6 }
  0x23   :  { %v30_v9 = vmul.f32 0.5, %v28_v7 }
  0x24   :  { %v31_v10 = vmul.f32 %v29_v8, %v21_v0 }
  0x25   :  { %v32_v11 = vmul.f32 %v30_v9, %v22_v1 }
  0x26   :  { %33 = vst [vmem:[#allocation5] sm:$0xff] %v31_v10 }
  0x27   :  { %34 = vst [vmem:[#allocation5 + $0x8] sm:$0xff] %v32_v11 }
  0x28   :  { %89 = shalt.err (!%p86_p12)
}
  0x29   :  { %s90_s22 = scalar_lea.hbm %s141_s1, 256 }
  0x2a   :  { %p91_p13 = scmp.ne.s32.totalorder %s141_s1, %s90_s22  ;;  %p94_p0 = scmp.lt.u32.totalorder %s90_s22, %s141_s1 }
  0x2c   :  { %p96_p1 = pnand %p94_p0, %p91_p13 }
  0x2e   :  { %99 = shalt.err (!%p96_p1)
}
  0x2f   :  { %44 = dma.vmem_to_hbm [thread:$0]  %s42_s19, 256, %s141_s1, [#allocation4]  }
  0x30   :  { %102 = dma.done.wait [#allocation4], 256  }
  0x31   :  { %103 = vsyncadd [#allocation4], 4294967040 }
  0x32   :  { %48 = vsyncpa [#allocation3], 1 }
  0x33   :  { %49 = vsyncpa [#allocation4], 1 }

</bundles_post_ra>
